<compile_context>
chip_gen: v7x
topology: tpu7x:2x2x1
jax: 0.10.0
libtpu: 0.0.40
codegen_flags: <defaults>
</compile_context>

<pallas_src>
import functools

import jax
import jax.numpy as jnp
from jax import lax
from jax.experimental import pallas as pl
from jax.experimental.pallas import tpu as pltpu

_EPS = 1e-12


def _loss_td_surv_kernel(h_ref, tgt_ref, out_ref, *, n_rows):
    # h_ref:   [block_n, T] hazard probabilities, natural row-major layout
    # tgt_ref: [2, block_n]  row 0 = duration bin (as float), row 1 = event flag
    # out_ref: [8, 128]      per-tile partial sums (row 0, lanes 0..3)
    bn, T = h_ref.shape

    # ---- lane validity for the (possibly ragged / OOB) tile ----------------
    lane1 = lax.broadcasted_iota(jnp.int32, (1, bn), 1)
    valid = (pl.program_id(0) * bn + lane1) < n_rows                   # [1, bn]

    # Invalid lanes get idx = -1 and ev = 0: every time-mask below becomes
    # empty and every contribution is EXACTLY zero (no eps leakage, no 0*inf).
    idx = jnp.where(valid, tgt_ref[0:1, :], -1.0).astype(jnp.int32)    # [1, bn]
    ev = jnp.where(valid, tgt_ref[1:2, :], 0.0)                        # [1, bn]

    # ---- in-kernel transpose to the lane-dense [T, block_n] layout ---------
    # ht[t, n] = h[n, t], computed as eye(T) @ h^T on the MXU (q @ k^T-style
    # contraction over the last dims of both operands).  A bf16 hi/lo split
    # keeps the identity product accurate to ~2^-18 regardless of MXU
    # precision, at negligible cost (MXU is otherwise idle in this kernel).
    r = lax.broadcasted_iota(jnp.int32, (T, T), 0)
    c = lax.broadcasted_iota(jnp.int32, (T, T), 1)
    eye = (r == c).astype(jnp.bfloat16)

    h32 = h_ref[...].astype(jnp.float32)                               # [bn, T]
    h_hi = h32.astype(jnp.bfloat16)
    h_lo = (h32 - h_hi.astype(jnp.float32)).astype(jnp.bfloat16)
    dn = (((1,), (1,)), ((), ()))                                      # A @ B^T
    ht = (lax.dot_general(eye, h_hi, dn, preferred_element_type=jnp.float32)
          + lax.dot_general(eye, h_lo, dn, preferred_element_type=jnp.float32))
    # ht: [T, bn], time on sublanes, batch on lanes (fully lane-dense vregs).

    t = lax.broadcasted_iota(jnp.int32, (T, bn), 0)

    # Single full-tile transcendental.
    log_1mh = jnp.log((1.0 + _EPS) - ht)                               # [T, bn]

    # Conditional survival log-prob: sum_{t < idx-1} log(1-h)  (pad_col conv.)
    log_St = jnp.sum(jnp.where(t < (idx - 1), log_1mh, 0.0),
                     axis=0, keepdims=True)                            # [1, bn]
    # NLL prefix: sum_{t <= idx} log(1-h+eps)
    nll_pre = jnp.sum(jnp.where(t <= idx, log_1mh, 0.0),
                      axis=0, keepdims=True)                           # [1, bn]

    # Gather hazard / log(1-h) at the event bin, THEN take the tiny log.
    sel = t == idx
    h_l = jnp.sum(jnp.where(sel, ht, 0.0), axis=0, keepdims=True)      # [1, bn]
    l1mh_l = jnp.sum(jnp.where(sel, log_1mh, 0.0), axis=0, keepdims=True)
    log_hl = jnp.log(h_l + _EPS)                                       # [1, bn]

    # L_z numerator / denominator (event rows only), accumulated separately.
    lz_row = -(log_hl + log_St)
    sum_ev_lz = jnp.sum(ev * lz_row)
    sum_ev = jnp.sum(ev)

    # L_c terms (all rows).  (Keeps the PyTorch 1-exp form for fidelity.)
    log_Wt = jnp.log(jnp.maximum(1.0 - jnp.exp(log_St), 1e-8))
    sum_lc = jnp.sum((1.0 - ev) * log_St + ev * log_Wt)

    # nll_logistic_hazard with phi = logit(h), restructured (see header).
    sum_nll = -(jnp.sum(nll_pre) + jnp.sum(ev * (log_hl - l1mh_l)))

    # ---- pack the 4 partial sums into row 0, lanes 0..3 ---------------------
    sub = lax.broadcasted_iota(jnp.int32, (8, 128), 0)
    lane = lax.broadcasted_iota(jnp.int32, (8, 128), 1)
    packed = jnp.where(lane == 0, sum_ev_lz,
             jnp.where(lane == 1, sum_ev,
             jnp.where(lane == 2, sum_lc, sum_nll)))
    out_ref[...] = jnp.where((sub == 0) & (lane < 4), packed, 0.0)


def loss_td_surv(preds, target, alpha=0.5, beta=1.0, block_n=2048):
    """Forward pass of LossTDSurv.

    preds:  [N, T, 1] hazard probabilities (float32 or bfloat16).
    target: [N, 2]    column 0 = duration bin, column 1 = event indicator.
    """
    N, T = preds.shape[0], preds.shape[1]

    # Natural layouts — no HBM-materialized transpose of preds.
    h = preds[..., 0]                                    # [N, T] (free squeeze)
    tgt = jnp.transpose(target.astype(jnp.float32))      # [2, N]  (tiny array)

    def _round_up_128(x):
        return 128 * ((x + 127) // 128)

    # VMEM budget: double-buffered input tiles plus ~4 full-tile f32
    # temporaries; stays well under the 32 MiB scoped limit that is safe on
    # v5e/v6e and on v7x (64 MiB physical VMEM).
    vmem_budget = 24 * 1024 * 1024
    bn = min(block_n, max(128, (vmem_budget // (24 * (T + 4))) // 128 * 128))
    if N > 256:
        # Keep at least 2 parallel batch tiles so v7x's 2 TensorCores share work.
        bn = min(bn, _round_up_128((N + 1) // 2))
    bn = max(128, min(bn, _round_up_128(N)))

    # Only a tiny alignment pad when the whole batch is narrower than one vreg
    # row of lanes; larger batches rely on the in-kernel validity mask (no
    # full-array jnp.pad, hence no extra HBM round trip).
    if N < 128:
        h = jnp.pad(h, ((0, 128 - N), (0, 0)))
        tgt = jnp.pad(tgt, ((0, 0), (0, 128 - N)))

    num_tiles = pl.cdiv(h.shape[0], bn)

    partials = pl.pallas_call(
        functools.partial(_loss_td_surv_kernel, n_rows=N),
        out_shape=jax.ShapeDtypeStruct((num_tiles * 8, 128), jnp.float32),
        grid=(num_tiles,),
        in_specs=[
            pl.BlockSpec((bn, T), lambda i: (i, 0)),     # hazards [N, T]
            pl.BlockSpec((2, bn), lambda i: (0, i)),     # packed idx/events
        ],
        out_specs=pl.BlockSpec((8, 128), lambda i: (i, 0)),
        compiler_params=pltpu.CompilerParams(
            dimension_semantics=("parallel",),
            vmem_limit_bytes=32 * 1024 * 1024,
        ),
    )(h, tgt)

    totals = jnp.sum(partials, axis=0)                   # [128]
    sum_ev_lz, sum_ev = totals[0], totals[1]
    sum_lc, sum_nll = totals[2], totals[3]

    # Guard an all-censored batch (0/0); a no-op whenever >= 1 event exists
    # (the PyTorch path would produce NaN in that degenerate case).
    L_z = sum_ev_lz / jnp.maximum(sum_ev, 1.0)
    L_c = -sum_lc / N
    nll = sum_nll / N
    return alpha * L_z + (1.0 - alpha) * L_c + beta * nll


def _reference_loss(preds, target, alpha=0.5, beta=1.0):
    """Pure-JAX reference mirroring the PyTorch semantics (for verification)."""
    h = preds[..., 0].astype(jnp.float32)
    idx = target[:, 0].astype(jnp.int32)
    ev = target[:, 1].astype(jnp.float32)
    N, T = h.shape
    j = jnp.arange(T)[None, :]
    idx_c = idx[:, None]
    ev_c = ev[:, None]

    log_St = jnp.sum(jnp.log(1.0 - h) * (j < (idx_c - 1)), axis=1)
    h_l = jnp.take_along_axis(h, idx_c, axis=1)[:, 0]
    lz_row = -(jnp.log(h_l) + log_St)
    L_z = jnp.sum(ev * lz_row) / jnp.sum(ev)

    log_Wt = jnp.log(jnp.maximum(1.0 - jnp.exp(log_St), 1e-8))
    c = 1.0 - ev
    L_c = -jnp.mean(c * log_St + (1 - c) * log_Wt)

    eps = 1e-12
    phi = jnp.log((h + eps) / (1.0 - h + eps))
    y = (j == idx_c).astype(jnp.float32) * ev_c
    bce = jnp.maximum(phi, 0.0) - phi * y + jnp.log1p(jnp.exp(-jnp.abs(phi)))
    nll = jnp.mean(jnp.sum(bce * (j <= idx_c), axis=1))

    return alpha * L_z + (1.0 - alpha) * L_c + beta * nll


if __name__ == "__main__":
    N, T = 8, 16
    key = jax.random.PRNGKey(0)
    k1, k2, k3 = jax.random.split(key, 3)

    preds = jax.nn.sigmoid(jax.random.normal(k1, (N, T, 1), dtype=jnp.float32))
    idx_durations = jax.random.randint(k2, (N,), 0, T)
    events = (jax.random.uniform(k3, (N,)) > 0.4).astype(jnp.float32)
    events = events.at[0].set(1.0)  # guarantee at least one uncensored sample
    target = jnp.stack([idx_durations.astype(jnp.float32), events], axis=1)

    loss = loss_td_surv(preds, target, alpha=0.5, beta=1.0)
    jax.block_until_ready(loss)

    ref = _reference_loss(preds, target, alpha=0.5, beta=1.0)
    assert jnp.isfinite(loss), "loss is not finite"
    assert jnp.allclose(loss, ref, rtol=1e-3, atol=1e-3), (loss, ref)

    print("KERNEL_OK")
</pallas_src>

<mosaic_0001>
module attributes {stable_mosaic.version = 11 : i64} {
  func.func @_loss_td_surv_kernel(%arg0: i32, %arg1: memref<128x16xf32, #tpu.memory_space<vmem>>, %arg2: memref<2x128xf32, #tpu.memory_space<vmem>>, %arg3: memref<8x128xf32, #tpu.memory_space<vmem>>) attributes {dimension_semantics = [#tpu.dimension_semantics<parallel>], iteration_bounds = array<i64: 1>, scalar_prefetch = 0 : i64, scratch_operands = 0 : i64, tpu.core_type = #tpu.core_type<tc>, window_params = [{transform_indices = @transform_0, window_bounds = array<i64: 128, 16>}, {transform_indices = @transform_1, window_bounds = array<i64: 2, 128>}, {transform_indices = @transform_2, window_bounds = array<i64: 8, 128>}]} {
    %0 = tpu.iota {dimensions = array<i32: 1>} : vector<1x128xi32>
    %c128_i32 = arith.constant 128 : i32
    %1 = arith.muli %arg0, %c128_i32 : i32
    %2 = vector.broadcast %1 : i32 to vector<1x128xi32>
    %3 = arith.addi %2, %0 : vector<1x128xi32>
    %c8_i32 = arith.constant 8 : i32
    %4 = vector.broadcast %c8_i32 : i32 to vector<1x128xi32>
    %5 = arith.cmpi slt, %3, %4 : vector<1x128xi32>
    %c0 = arith.constant 0 : index
    %c0_0 = arith.constant 0 : index
    %6 = vector.load %arg2[%c0, %c0_0] : memref<2x128xf32, #tpu.memory_space<vmem>>, vector<1x128xf32>
    %cst = arith.constant -1.000000e+00 : f32
    %7 = vector.broadcast %cst : f32 to vector<1x128xf32>
    %8 = arith.select %5, %6, %7 : vector<1x128xi1>, vector<1x128xf32>
    %9 = arith.fptosi %8 : vector<1x128xf32> to vector<1x128xi32>
    %c1 = arith.constant 1 : index
    %c0_1 = arith.constant 0 : index
    %10 = vector.load %arg2[%c1, %c0_1] : memref<2x128xf32, #tpu.memory_space<vmem>>, vector<1x128xf32>
    %cst_2 = arith.constant 0.000000e+00 : f32
    %11 = vector.broadcast %cst_2 : f32 to vector<1x128xf32>
    %12 = arith.select %5, %10, %11 : vector<1x128xi1>, vector<1x128xf32>
    %13 = tpu.iota {dimensions = array<i32: 0>} : vector<16x16xi32>
    %14 = tpu.iota {dimensions = array<i32: 1>} : vector<16x16xi32>
    %15 = arith.cmpi eq, %13, %14 : vector<16x16xi32>
    %16 = arith.extui %15 : vector<16x16xi1> to vector<16x16xi32>
    %17 = arith.sitofp %16 : vector<16x16xi32> to vector<16x16xf32>
    %18 = arith.truncf %17 : vector<16x16xf32> to vector<16x16xbf16>
    %c0_3 = arith.constant 0 : index
    %c0_4 = arith.constant 0 : index
    %19 = vector.load %arg1[%c0_3, %c0_4] : memref<128x16xf32, #tpu.memory_space<vmem>>, vector<128x16xf32>
    %20 = arith.truncf %19 : vector<128x16xf32> to vector<128x16xbf16>
    %21 = arith.extf %20 : vector<128x16xbf16> to vector<128x16xf32>
    %22 = arith.subf %19, %21 : vector<128x16xf32>
    %23 = arith.truncf %22 : vector<128x16xf32> to vector<128x16xbf16>
    %cst_5 = arith.constant dense<0.000000e+00> : vector<16x128xf32>
    %24 = tpu.matmul %18, %20, %cst_5 {dimension_numbers = #tpu.dot_dimension_numbers<[1], [1], [0], [0], [0, 0, 1, 0], [], []>} : vector<16x16xbf16>, vector<128x16xbf16>, vector<16x128xf32> -> vector<16x128xf32>
    %cst_6 = arith.constant dense<0.000000e+00> : vector<16x128xf32>
    %25 = tpu.matmul %18, %23, %cst_6 {dimension_numbers = #tpu.dot_dimension_numbers<[1], [1], [0], [0], [0, 0, 1, 0], [], []>} : vector<16x16xbf16>, vector<128x16xbf16>, vector<16x128xf32> -> vector<16x128xf32>
    %26 = arith.addf %24, %25 : vector<16x128xf32>
    %27 = tpu.iota {dimensions = array<i32: 0>} : vector<16x128xi32>
    %cst_7 = arith.constant 1.000000e+00 : f32
    %28 = vector.broadcast %cst_7 : f32 to vector<16x128xf32>
    %29 = arith.subf %28, %26 : vector<16x128xf32>
    %30 = math.log %29 : vector<16x128xf32>
    %c1_i32 = arith.constant 1 : i32
    %31 = vector.broadcast %c1_i32 : i32 to vector<1x128xi32>
    %32 = arith.subi %9, %31 : vector<1x128xi32>
    %33 = vector.broadcast %32 : vector<1x128xi32> to vector<16x128xi32>
    %34 = arith.cmpi slt, %27, %33 : vector<16x128xi32>
    %cst_8 = arith.constant 0.000000e+00 : f32
    %35 = vector.broadcast %cst_8 : f32 to vector<16x128xf32>
    %36 = arith.select %34, %30, %35 : vector<16x128xi1>, vector<16x128xf32>
    %cst_9 = arith.constant dense<0.000000e+00> : vector<128xf32>
    %37 = vector.multi_reduction <add>, %36, %cst_9 [0] : vector<16x128xf32> to vector<128xf32>
    %38 = vector.shape_cast %37 : vector<128xf32> to vector<1x128xf32>
    %39 = vector.broadcast %9 : vector<1x128xi32> to vector<16x128xi32>
    %40 = arith.cmpi sle, %27, %39 : vector<16x128xi32>
    %cst_10 = arith.constant 0.000000e+00 : f32
    %41 = vector.broadcast %cst_10 : f32 to vector<16x128xf32>
    %42 = arith.select %40, %30, %41 : vector<16x128xi1>, vector<16x128xf32>
    %cst_11 = arith.constant dense<0.000000e+00> : vector<128xf32>
    %43 = vector.multi_reduction <add>, %42, %cst_11 [0] : vector<16x128xf32> to vector<128xf32>
    %44 = vector.shape_cast %43 : vector<128xf32> to vector<1x128xf32>
    %45 = vector.broadcast %9 : vector<1x128xi32> to vector<16x128xi32>
    %46 = arith.cmpi eq, %27, %45 : vector<16x128xi32>
    %cst_12 = arith.constant 0.000000e+00 : f32
    %47 = vector.broadcast %cst_12 : f32 to vector<16x128xf32>
    %48 = arith.select %46, %26, %47 : vector<16x128xi1>, vector<16x128xf32>
    %cst_13 = arith.constant dense<0.000000e+00> : vector<128xf32>
    %49 = vector.multi_reduction <add>, %48, %cst_13 [0] : vector<16x128xf32> to vector<128xf32>
    %50 = vector.shape_cast %49 : vector<128xf32> to vector<1x128xf32>
    %cst_14 = arith.constant 0.000000e+00 : f32
    %51 = vector.broadcast %cst_14 : f32 to vector<16x128xf32>
    %52 = arith.select %46, %30, %51 : vector<16x128xi1>, vector<16x128xf32>
    %cst_15 = arith.constant dense<0.000000e+00> : vector<128xf32>
    %53 = vector.multi_reduction <add>, %52, %cst_15 [0] : vector<16x128xf32> to vector<128xf32>
    %54 = vector.shape_cast %53 : vector<128xf32> to vector<1x128xf32>
    %cst_16 = arith.constant 9.99999996E-13 : f32
    %55 = vector.broadcast %cst_16 : f32 to vector<1x128xf32>
    %56 = arith.addf %50, %55 : vector<1x128xf32>
    %57 = math.log %56 : vector<1x128xf32>
    %58 = arith.addf %57, %38 : vector<1x128xf32>
    %cst_17 = arith.constant 0.000000e+00 : f32
    %59 = vector.broadcast %cst_17 : f32 to vector<1x128xf32>
    %60 = arith.subf %59, %58 : vector<1x128xf32>
    %61 = arith.mulf %12, %60 : vector<1x128xf32>
    %62 = vector.shape_cast %61 : vector<1x128xf32> to vector<1x1x128xf32>
    %cst_18 = arith.constant dense<0.000000e+00> : vector<1xf32>
    %63 = vector.multi_reduction <add>, %62, %cst_18 [1, 2] : vector<1x1x128xf32> to vector<1xf32>
    %64 = vector.shape_cast %63 : vector<1xf32> to vector<1x1x1xf32>
    %65 = vector.extract %64[0, 0, 0] : f32 from vector<1x1x1xf32>
    %66 = vector.shape_cast %12 : vector<1x128xf32> to vector<1x1x128xf32>
    %cst_19 = arith.constant dense<0.000000e+00> : vector<1xf32>
    %67 = vector.multi_reduction <add>, %66, %cst_19 [1, 2] : vector<1x1x128xf32> to vector<1xf32>
    %68 = vector.shape_cast %67 : vector<1xf32> to vector<1x1x1xf32>
    %69 = vector.extract %68[0, 0, 0] : f32 from vector<1x1x1xf32>
    %70 = math.exp %38 : vector<1x128xf32>
    %cst_20 = arith.constant 1.000000e+00 : f32
    %71 = vector.broadcast %cst_20 : f32 to vector<1x128xf32>
    %72 = arith.subf %71, %70 : vector<1x128xf32>
    %cst_21 = arith.constant 9.99999993E-9 : f32
    %73 = vector.broadcast %cst_21 : f32 to vector<1x128xf32>
    %74 = arith.maximumf %72, %73 : vector<1x128xf32>
    %75 = math.log %74 : vector<1x128xf32>
    %cst_22 = arith.constant 1.000000e+00 : f32
    %76 = vector.broadcast %cst_22 : f32 to vector<1x128xf32>
    %77 = arith.subf %76, %12 : vector<1x128xf32>
    %78 = arith.mulf %77, %38 : vector<1x128xf32>
    %79 = arith.mulf %12, %75 : vector<1x128xf32>
    %80 = arith.addf %78, %79 : vector<1x128xf32>
    %81 = vector.shape_cast %80 : vector<1x128xf32> to vector<1x1x128xf32>
    %cst_23 = arith.constant dense<0.000000e+00> : vector<1xf32>
    %82 = vector.multi_reduction <add>, %81, %cst_23 [1, 2] : vector<1x1x128xf32> to vector<1xf32>
    %83 = vector.shape_cast %82 : vector<1xf32> to vector<1x1x1xf32>
    %84 = vector.extract %83[0, 0, 0] : f32 from vector<1x1x1xf32>
    %85 = vector.shape_cast %44 : vector<1x128xf32> to vector<1x1x128xf32>
    %cst_24 = arith.constant dense<0.000000e+00> : vector<1xf32>
    %86 = vector.multi_reduction <add>, %85, %cst_24 [1, 2] : vector<1x1x128xf32> to vector<1xf32>
    %87 = vector.shape_cast %86 : vector<1xf32> to vector<1x1x1xf32>
    %88 = vector.extract %87[0, 0, 0] : f32 from vector<1x1x1xf32>
    %89 = arith.subf %57, %54 : vector<1x128xf32>
    %90 = arith.mulf %12, %89 : vector<1x128xf32>
    %91 = vector.shape_cast %90 : vector<1x128xf32> to vector<1x1x128xf32>
    %cst_25 = arith.constant dense<0.000000e+00> : vector<1xf32>
    %92 = vector.multi_reduction <add>, %91, %cst_25 [1, 2] : vector<1x1x128xf32> to vector<1xf32>
    %93 = vector.shape_cast %92 : vector<1xf32> to vector<1x1x1xf32>
    %94 = vector.extract %93[0, 0, 0] : f32 from vector<1x1x1xf32>
    %95 = arith.addf %88, %94 : f32
    %cst_26 = arith.constant 0.000000e+00 : f32
    %96 = arith.subf %cst_26, %95 : f32
    %97 = tpu.iota {dimensions = array<i32: 0>} : vector<8x128xi32>
    %98 = tpu.iota {dimensions = array<i32: 1>} : vector<8x128xi32>
    %c0_i32 = arith.constant 0 : i32
    %99 = vector.broadcast %c0_i32 : i32 to vector<8x128xi32>
    %100 = arith.cmpi eq, %98, %99 : vector<8x128xi32>
    %c1_i32_27 = arith.constant 1 : i32
    %101 = vector.broadcast %c1_i32_27 : i32 to vector<8x128xi32>
    %102 = arith.cmpi eq, %98, %101 : vector<8x128xi32>
    %c2_i32 = arith.constant 2 : i32
    %103 = vector.broadcast %c2_i32 : i32 to vector<8x128xi32>
    %104 = arith.cmpi eq, %98, %103 : vector<8x128xi32>
    %105 = vector.broadcast %84 : f32 to vector<8x128xf32>
    %106 = vector.broadcast %96 : f32 to vector<8x128xf32>
    %107 = arith.select %104, %105, %106 : vector<8x128xi1>, vector<8x128xf32>
    %108 = vector.broadcast %69 : f32 to vector<8x128xf32>
    %109 = arith.select %102, %108, %107 : vector<8x128xi1>, vector<8x128xf32>
    %110 = vector.broadcast %65 : f32 to vector<8x128xf32>
    %111 = arith.select %100, %110, %109 : vector<8x128xi1>, vector<8x128xf32>
    %c0_i32_28 = arith.constant 0 : i32
    %112 = vector.broadcast %c0_i32_28 : i32 to vector<8x128xi32>
    %113 = arith.cmpi eq, %97, %112 : vector<8x128xi32>
    %c4_i32 = arith.constant 4 : i32
    %114 = vector.broadcast %c4_i32 : i32 to vector<8x128xi32>
    %115 = arith.cmpi slt, %98, %114 : vector<8x128xi32>
    %116 = arith.andi %113, %115 : vector<8x128xi1>
    %cst_29 = arith.constant 0.000000e+00 : f32
    %117 = vector.broadcast %cst_29 : f32 to vector<8x128xf32>
    %118 = arith.select %116, %111, %117 : vector<8x128xi1>, vector<8x128xf32>
    %c0_30 = arith.constant 0 : index
    %c0_31 = arith.constant 0 : index
    %119 = vector.load %arg3[%c0_30, %c0_31] : memref<8x128xf32, #tpu.memory_space<vmem>>, vector<8x128xf32>
    tpu.vector_store %arg3[%c0_30, %c0_31], %118 {strides = array<i32>} : memref<8x128xf32, #tpu.memory_space<vmem>>, vector<8x128xf32>,
    return
  }
  func.func @transform_0(%arg0: i32) -> (i32, i32) {
    %c0_i32 = arith.constant 0 : i32
    %c0_i32_0 = arith.constant 0 : i32
    return %arg0, %c0_i32 : i32, i32
  }
  func.func @transform_1(%arg0: i32) -> (i32, i32) {
    %c0_i32 = arith.constant 0 : i32
    %c0_i32_0 = arith.constant 0 : i32
    return %c0_i32, %arg0 : i32, i32
  }
  func.func @transform_2(%arg0: i32) -> (i32, i32) {
    %c0_i32 = arith.constant 0 : i32
    %c0_i32_0 = arith.constant 0 : i32
    return %arg0, %c0_i32 : i32, i32
  }
}

</mosaic_0001>

<bundles_post_ra>
// kernel: tpu_custom_call.1
= control target key start
LH: loop header
LB: loop body
LE: loop exit
PB: predicated region body
PF: predicated region fallthrough
CT: control target
= control target key end

     0   :  { %vm98_vm0 = vcmask 130048   ;;  %v503_v3 = vmov 0.0   ;;  %vm504_vm1 = vmmov 0   ;;  %s669_s0 = inlined_call_operand.vmem [shape: f32[128,16], index: 0, kind: input, shape index: {}]   ;;  %s670_s1 = inlined_call_operand.vmem [shape: f32[2,128], index: 1, kind: input, shape index: {}]   ;;  %s671_s2 = inlined_call_operand.hbm [shape: f32[8,128], index: 2, kind: output, shape index: {}]  }
   0x1   :  { %v34_v0 = vld [vmem:[%s669_s0] sm:$0xff]  ;;  %v35_v1 = vld [vmem:[%s669_s0 + $0x8] sm:$0xff]  ;;  %v36_v2 = vld [vmem:[%s669_s0 + $0x10] sm:$0xff]  ;;  %432 = vmatprep.subr.bf16.mxu0 %v503_v3  ;;  %412 = vmatprep.subr.bf16.mxu1 %v503_v3 }
   0x2   :  { %v50_v4 = vpack.c.bf16 %v35_v1, %v34_v0  ;;  %v37_v5 = vld [vmem:[%s669_s0 + $0x18] sm:$0xff]  ;;  %448 = vmatprep.mubr.msk.bf16.mxu0 %vm504_vm1, %v503_v3  ;;  %428 = vmatprep.mubr.msk.bf16.mxu1 %vm504_vm1, %v503_v3  ;;  %v38_v12 = vld [vmem:[%s669_s0 + $0x20] sm:$0xff]  ;;  %v39_v13 = vld [vmem:[%s669_s0 + $0x28] sm:$0xff] }
   0x3   :  { %v51_v6 = vpack.c.bf16 %v37_v5, %v36_v2 }
   0x4   :  { %v168_v7 = vsel %vm98_vm0, %v50_v4, 0  ;;  %v58_v8 = vunpack.c.l.bf16 %v50_v4  ;;  %v59_v9 = vunpack.c.h.bf16 %v50_v4 }
   0x5   :  { %433 = vmatpush3.bf16.xpose.msra.mxu0 %v168_v7  ;;  %v60_v10 = vunpack.c.l.bf16 %v51_v6  ;;  %v61_v11 = vunpack.c.h.bf16 %v51_v6 }
   0x6   :  { %v74_v14 = vsub.f32 %v34_v0, %v58_v8  ;;  %v75_v15 = vsub.f32 %v35_v1, %v59_v9  ;;  %434 = vmatprep.subr.bf16.mxu0 %v503_v3 }
   0x7   :  { %7 = vsyncpa [#allocation3], 0  ;;  %v76_v17 = vsub.f32 %v36_v2, %v60_v10  ;;  %v77_v18 = vsub.f32 %v37_v5, %v61_v11  ;;  %v52_v19 = vpack.c.bf16 %v39_v13, %v38_v12  ;;  %v171_v21 = vsel %vm98_vm0, %v51_v6, 0  ;;  %v40_v25 = vld [vmem:[%s669_s0 + $0x30] sm:$0xff]  ;;  %v41_v26 = vld [vmem:[%s669_s0 + $0x38] sm:$0xff]  ;;  %s505_s22 = smov [#allocation2]  }
   0x8   :  { %v90_v16 = vpack.c.bf16 %v75_v15, %v74_v14  ;;  %v53_v30 = vpack.c.bf16 %v41_v26, %v40_v25  ;;  %v42_v35 = vld [vmem:[%s669_s0 + $0x40] sm:$0xff]  ;;  %v43_v36 = vld [vmem:[%s669_s0 + $0x48] sm:$0xff]  ;;  %v44_v45 = vld [vmem:[%s669_s0 + $0x50] sm:$0xff]  ;;  %v13_v4 = vlaneseq  ;;  %vm295_vm5 = vcmask 1040384   ;;  %s381_s23 = sshll.u32 %s505_s22, 4  ;;  %s382_s23 = int_to_ptr.vmem [resolvable:$true] %s381_s23 }
   0x9   :  { %v91_v22 = vpack.c.bf16 %v77_v18, %v76_v17  ;;  %v62_v23 = vunpack.c.l.bf16 %v52_v19  ;;  %v63_v24 = vunpack.c.h.bf16 %v52_v19  ;;  %v174_v31 = vsel %vm98_vm0, %v52_v19, 0  ;;  %v45_v46 = vld [vmem:[%s669_s0 + $0x58] sm:$0xff]  ;;  %v46_v55 = vld [vmem:[%s669_s0 + $0x60] sm:$0xff]  ;;  %v47_v56 = vld [vmem:[%s669_s0 + $0x68] sm:$0xff]  ;;  %s479_s24 = scalar_lea.vmem %s382_s23, 128  ;;  %p484_p1 = scmp.lt.s32.totalorder %s382_s23, %s382_s23 }
   0xa   :  { %v103_v20 = vsel %vm98_vm0, %v90_v16, 0  ;;  %v64_v33 = vunpack.c.l.bf16 %v53_v30  ;;  %v65_v34 = vunpack.c.h.bf16 %v53_v30  ;;  %v54_v40 = vpack.c.bf16 %v43_v36, %v42_v35  ;;  %v48_v1 = vld [vmem:[%s669_s0 + $0x70] sm:$0xff]  ;;  %v49_v2 = vld [vmem:[%s669_s0 + $0x78] sm:$0xff]  ;;  %p480_p0 = scmp.ne.s32.totalorder %s382_s23, %s479_s24  ;;  %p485_p2 = scmp.lt.s32.totalorder %s479_s24, %s479_s24 }
   0xb   :  { %413 = vmatpush3.bf16.xpose.msra.mxu1 %v103_v20  ;;  %v106_v27 = vsel %vm98_vm0, %v91_v22, 0  ;;  %v78_v28 = vsub.f32 %v38_v12, %v62_v23  ;;  %v79_v29 = vsub.f32 %v39_v13, %v63_v24  ;;  %v177_v41 = vsel %vm98_vm0, %v53_v30, 0 }
   0xc   :  { %414 = vmatprep.subr.bf16.mxu1 %v503_v3  ;;  %v80_v38 = vsub.f32 %v40_v25, %v64_v33  ;;  %v81_v39 = vsub.f32 %v41_v26, %v65_v34  ;;  %v66_v43 = vunpack.c.l.bf16 %v54_v40  ;;  %v67_v44 = vunpack.c.h.bf16 %v54_v40  ;;  %v22_v25 = vld [vmem:[%s670_s1 + $0x1] sm:$0x1]  ;;  %p486_p3 = por %p485_p2, %p484_p1 }
   0xd   :  { %435 = vmatpush3.bf16.xpose.msra.mxu0 %v171_v21  ;;  %v92_v32 = vpack.c.bf16 %v79_v29, %v78_v28  ;;  %v55_v50 = vpack.c.bf16 %v45_v46, %v44_v45  ;;  %v180_v51 = vsel %vm98_vm0, %v54_v40, 0  ;;  %v56_v60 = vpack.c.bf16 %v47_v56, %v46_v55 }
   0xe   :  { %436 = vmatprep.subr.bf16.mxu0 %v503_v3  ;;  %v93_v42 = vpack.c.bf16 %v81_v39, %v80_v38  ;;  %v82_v48 = vsub.f32 %v42_v35, %v66_v43  ;;  %v83_v49 = vsub.f32 %v43_v36, %v67_v44  ;;  %v57_v8 = vpack.c.bf16 %v49_v2, %v48_v1  ;;  %p487_p4 = pnand %p486_p3, %p480_p0 }
   0xf   :  { %v109_v37 = vsel %vm98_vm0, %v92_v32, 0  ;;  %v68_v53 = vunpack.c.l.bf16 %v55_v50  ;;  %v69_v54 = vunpack.c.h.bf16 %v55_v50  ;;  %v183_v61 = vsel %vm98_vm0, %v55_v50, 0 }
  0x10   :  { %v112_v47 = vsel %vm98_vm0, %v93_v42, 0  ;;  %v94_v52 = vpack.c.bf16 %v83_v49, %v82_v48  ;;  %v70_v63 = vunpack.c.l.bf16 %v56_v60  ;;  %v71_v0 = vunpack.c.h.bf16 %v56_v60 }
  0x11   :  { %v84_v58 = vsub.f32 %v44_v45, %v68_v53  ;;  %v85_v59 = vsub.f32 %v45_v46, %v69_v54  ;;  %v186_v9 = vsel %vm98_vm0, %v56_v60, 0  ;;  %v597_v10 = vshrl.u32 %v13_v4, 7 }
  0x12   :  { %v115_v57 = vsel %vm98_vm0, %v94_v52, 0  ;;  %v86_v6 = vsub.f32 %v46_v55, %v70_v63  ;;  %v87_v7 = vsub.f32 %v47_v56, %v71_v0  ;;  %v72_v12 = vunpack.c.l.bf16 %v57_v8 }
  0x13   :  { %415 = vmatpush3.bf16.xpose.msra.mxu1 %v106_v27  ;;  %v95_v62 = vpack.c.bf16 %v85_v59, %v84_v58  ;;  %v73_v13 = vunpack.c.h.bf16 %v57_v8  ;;  %v601_v14 = vand.u32 127, %v13_v4  ;;  %v604_v15 = vadd.s32 8, %v597_v10  ;;  %v19_v27 = vld [vmem:[%s670_s1] sm:$0x1] }
  0x14   :  { %416 = vmatprep.subr.bf16.mxu1 %v503_v3  ;;  %v96_v11 = vpack.c.bf16 %v87_v7, %v86_v6  ;;  %v88_v17 = vsub.f32 %v48_v1, %v72_v12  ;;  %v189_v19 = vsel %vm98_vm0, %v57_v8, 0  ;;  %vm370_vm13 = vcmp.eq.s32.totalorder %v597_v10, 0 }
  0x15   :  { %437 = vmatpush3.bf16.xpose.msra.mxu0 %v174_v31  ;;  %v118_v5 = vsel %vm98_vm0, %v95_v62, 0  ;;  %v89_v18 = vsub.f32 %v49_v2, %v73_v13  ;;  %vm27_vm2 = vcmp.eq.s32.totalorder %v597_v10, %v601_v14  ;;  %vm28_vm3 = vcmp.eq.s32.totalorder %v604_v15, %v601_v14 }
  0x16   :  { %438 = vmatprep.subr.bf16.mxu0 %v503_v3  ;;  %v121_v16 = vsel %vm98_vm0, %v96_v11, 0  ;;  %v389_v21 = vsel %vm27_vm2, 1.0, %v503_v3  ;;  %v390_v22 = vsel %vm28_vm3, 1.0, %v503_v3  ;;  %vm18_vm4 = vcmp.lt.s32.totalorder %v601_v14, 8 }
  0x17   :  { %v97_v20 = vpack.c.bf16 %v89_v18, %v88_v17  ;;  %v33_v24 = vpack.c.bf16 %v390_v22, %v389_v21  ;;  %v622_v26 = vsel %vm18_vm4, %v22_v25, 0.0  ;;  %v20_v28 = vsel %vm18_vm4, %v19_v27, -1.0 }
  0x18   :  { %v454_v29 = vtrunc.f32 %v20_v28  ;;  %v241_v31 = vsub.s32 0, %v597_v10  ;;  %vm362_vm12 = vcmp.eq.s32.totalorder %v601_v14, 2  ;;  %vm371_vm14 = vcmp.lt.s32.totalorder %v601_v14, 4 }
  0x19   :  { %v124_v23 = vsel %vm98_vm0, %v97_v20, 0  ;;  %vm361_vm15 = vcmp.eq.s32.totalorder %v601_v14, 1  ;;  %vm372_vm1 = vmand %vm370_vm13, %vm371_vm14 }
  0x1a   :  { %v455_v30 = vcvt.f32.s32 %v454_v29 }
  0x1b   :  { %417 = vmatpush3.bf16.xpose.msra.mxu1 %v109_v37 }
  0x1c   :  { %418 = vmatprep.subr.bf16.mxu1 %v503_v3  ;;  %v257_v35 = vrot.slane %v455_v30, %v241_v31  ;;  %v393_v48 = vadd.s32 4294967295, %v455_v30 }
  0x1d   :  { %439 = vmatpush3.bf16.xpose.msra.mxu0 %v177_v41 }
  0x1e   :  { %440 = vmatprep.subr.bf16.mxu0 %v503_v3  ;;  %vm269_vm6 = vcmp.eq.s32.totalorder %v597_v10, %v257_v35  ;;  %vm270_vm7 = vcmp.eq.s32.totalorder %v604_v15, %v257_v35  ;;  %vm258_vm9 = vcmp.le.s32.totalorder %v597_v10, %v257_v35  ;;  %vm259_vm11 = vcmp.le.s32.totalorder %v604_v15, %v257_v35 }
  0x23   :  { %419 = vmatpush3.bf16.xpose.msra.mxu1 %v112_v47 }
  0x24   :  { %420 = vmatprep.subr.bf16.mxu1 %v503_v3 }
  0x25   :  { %441 = vmatpush3.bf16.xpose.msra.mxu0 %v180_v51  ;;  %v242_v51 = vrot.slane %v393_v48, %v241_v31 }
  0x26   :  { %442 = vmatprep.subr.bf16.mxu0 %v503_v3 }
  0x27   :  { %vm243_vm8 = vcmp.lt.s32.totalorder %v597_v10, %v242_v51  ;;  %vm244_vm10 = vcmp.lt.s32.totalorder %v604_v15, %v242_v51 }
  0x2b   :  { %421 = vmatpush3.bf16.xpose.msra.mxu1 %v115_v57 }
  0x2c   :  { %422 = vmatprep.subr.bf16.mxu1 %v503_v3 }
  0x2d   :  { %443 = vmatpush3.bf16.xpose.msra.mxu0 %v183_v61 }
  0x2e   :  { %444 = vmatprep.subr.bf16.mxu0 %v503_v3 }
  0x33   :  { %423 = vmatpush3.bf16.xpose.msra.mxu1 %v118_v5 }
  0x34   :  { %424 = vmatprep.subr.bf16.mxu1 %v503_v3 }
  0x35   :  { %445 = vmatpush3.bf16.xpose.msra.mxu0 %v186_v9 }
  0x36   :  { %446 = vmatprep.subr.bf16.mxu0 %v503_v3 }
  0x3b   :  { %425 = vmatpush3.bf16.xpose.msra.mxu1 %v121_v16 }
  0x3c   :  { %426 = vmatprep.subr.bf16.mxu1 %v503_v3  ;;  %v306_v3 = vsel %vm295_vm5, %v622_v26, 0.0 }
  0x3d   :  { %447 = vmatpush3.bf16.xpose.msra.mxu0 %v189_v19  ;;  %307 = vadd.xlane.f32.xlu0 %v306_v3 }
  0x43   :  { %427 = vmatpush3.bf16.xpose.msra.mxu1 %v124_v23 }
  0x44   :  { %449 = vmatmul.mubr.msk.bf16.vlgmr.msra.gmra.mrb[0].mxu0 %vm98_vm0, %v33_v24 }
  0x4a   :  { %429 = vmatmul.mubr.msk.bf16.vlgmr.msra.gmra.mrb[0].mxu1 %vm98_vm0, %v33_v24  ;;  %vm360_vm0 = vcmp.eq.s32.totalorder %v601_v14, 0 }
  0xca   :  { %v308_v48 = vpop.xlane.xlu0 %307 }
 0x117   :  { %v225_v32 = vpop.f32.mrb[0].mxu0 }
 0x118   :  { %v450_v33 = vpop.f32.mrb[1].mxu0 }
 0x119   :  { %v228_v34 = vpop.f32.mrb[2].mxu0 }
 0x11a   :  { %v451_v36 = vpop.f32.mrb[3].mxu0 }
 0x11d   :  { %v160_v37 = vpop.f32.mrb[0].mxu1 }
 0x11e   :  { %v226_v38 = vadd.f32 %v225_v32, %v160_v37  ;;  %v430_v39 = vpop.f32.mrb[1].mxu1  ;;  %v322_v37 = vsub.f32 1.0, %v622_v26 }
 0x11f   :  { %v163_v40 = vpop.f32.mrb[2].mxu1 }
 0x120   :  { %v232_v41 = vsub.f32 1.0, %v226_v38  ;;  %v271_v42 = vsel %vm269_vm6, %v226_v38, 0.0  ;;  %v229_v43 = vadd.f32 %v228_v34, %v163_v40  ;;  %v431_v44 = vpop.f32.mrb[3].mxu1 }
 0x122   :  { %469 = vlog2.f32 %v232_v41  ;;  %v233_v45 = vsub.f32 1.0, %v229_v43  ;;  %v272_v46 = vsel %vm270_vm7, %v229_v43, 0.0 }
 0x123   :  { %v273_v47 = vadd.f32 %v272_v46, %v271_v42 }
 0x124   :  { %471 = vlog2.f32 %v233_v45 }
 0x125   :  { %v274_v49 = vrot.slane %v273_v47, 4 }
 0x127   :  { %v275_v50 = vadd.f32 %v274_v49, %v273_v47  ;;  %v309_v49 = vrot.slane %v308_v48, 4 }
 0x129   :  { %v276_v52 = vrot.slane %v275_v50, 2 }
 0x12b   :  { %v277_v53 = vadd.f32 %v276_v52, %v275_v50  ;;  %v310_v50 = vadd.f32 %v309_v49, %v308_v48 }
 0x12c   :  { %v470_v54 = vpop.eup %469 }
 0x12d   :  { %v235_v55 = vmul.f32 0.6931472, %v470_v54  ;;  %v278_v56 = vrot.slane %v277_v53, 1  ;;  %v311_v51 = vrot.slane %v310_v50, 2 }
 0x12e   :  { %v472_v57 = vpop.eup %471 }
 0x12f   :  { %v245_v58 = vsel %vm243_vm8, %v235_v55, 0.0  ;;  %v280_v59 = vsel %vm269_vm6, %v235_v55, 0.0  ;;  %v237_v60 = vmul.f32 0.6931472, %v472_v57  ;;  %v279_v61 = vadd.f32 %v278_v56, %v277_v53 }
 0x130   :  { %v260_v62 = vsel %vm258_vm9, %v235_v55, 0.0  ;;  %v312_v54 = vadd.f32 %v311_v51, %v310_v50 }
 0x131   :  { %v246_v63 = vsel %vm244_vm10, %v237_v60, 0.0  ;;  %v281_v0 = vsel %vm270_vm7, %v237_v60, 0.0  ;;  %v289_v1 = vadd.f32 1e-12, %v279_v61  ;;  %v261_v2 = vsel %vm259_vm11, %v237_v60, 0.0 }
 0x132   :  { %v247_v4 = vadd.f32 %v246_v63, %v245_v58  ;;  %v282_v5 = vadd.f32 %v281_v0, %v280_v59  ;;  %v262_v6 = vadd.f32 %v261_v2, %v260_v62  ;;  %v313_v57 = vrot.slane %v312_v54, 1 }
 0x133   :  { %473 = vlog2.f32 %v289_v1 }
 0x134   :  { %v248_v7 = vrot.slane %v247_v4, 4  ;;  %v283_v8 = vrot.slane %v282_v5, 4  ;;  %v263_v33 = vrot.slane %v262_v6, 4  ;;  %v314_v59 = vadd.f32 %v313_v57, %v312_v54 }
 0x136   :  { %v249_v9 = vadd.f32 %v248_v7, %v247_v4  ;;  %v284_v11 = vadd.f32 %v283_v8, %v282_v5  ;;  %v264_v35 = vadd.f32 %v263_v33, %v262_v6 }
 0x138   :  { %v285_v12 = vrot.slane %v284_v11, 2  ;;  %v250_v13 = vrot.slane %v249_v9, 2  ;;  %v265_v36 = vrot.slane %v264_v35, 2 }
 0x13a   :  { %v251_v16 = vadd.f32 %v250_v13, %v249_v9  ;;  %v286_v17 = vadd.f32 %v285_v12, %v284_v11  ;;  %v266_v38 = vadd.f32 %v265_v36, %v264_v35 }
 0x13c   :  { %v252_v18 = vrot.slane %v251_v16, 1  ;;  %v287_v19 = vrot.slane %v286_v17, 1  ;;  %v267_v43 = vrot.slane %v266_v38, 1 }
 0x13d   :  { %v474_v20 = vpop.eup %473 }
 0x13e   :  { %v253_v21 = vadd.f32 %v252_v18, %v251_v16  ;;  %v291_v15 = vmul.f32 0.6931472, %v474_v20  ;;  %v288_v22 = vadd.f32 %v287_v19, %v286_v17  ;;  %v268_v46 = vadd.f32 %v267_v43, %v266_v38 }
 0x140   :  { %v292_v23 = vadd.f32 %v291_v15, %v253_v21  ;;  %v346_v24 = vsub.f32 %v291_v15, %v288_v22  ;;  %v316_v25 = vmul.f32 1.442695, %v253_v21  ;;  %v323_v41 = vmul.f32 %v322_v37, %v253_v21 }
 0x141   :  { %v336_v47 = vsel %vm295_vm5, %v268_v46, 0.0 }
 0x142   :  { %v293_v3 = vsub.f32 0.0, %v292_v23  ;;  %475 = vpow2.f32 %v316_v25  ;;  %v347_v29 = vmul.f32 %v346_v24, %v622_v26 }
 0x144   :  { %v294_v27 = vmul.f32 %v293_v3, %v622_v26  ;;  %v348_v30 = vsel %vm295_vm5, %v347_v29, 0.0 }
 0x146   :  { %v296_v28 = vsel %vm295_vm5, %v294_v27, 0.0 }
 0x147   :  { %297 = vadd.xlane.f32.xlu0 %v296_v28 }
 0x14b   :  { %349 = vadd.xlane.f32.xlu0 %v348_v30 }
 0x14c   :  { %v476_v31 = vpop.eup %475 }
 0x14d   :  { %v318_v32 = vsub.f32 1.0, %v476_v31 }
 0x14f   :  { %v319_v34 = vmax.f32 %v318_v32, 1e-08 }
 0x151   :  { %477 = vlog2.f32 %v319_v34 }
 0x15b   :  { %v478_v39 = vpop.eup %477 }
 0x15c   :  { %v321_v40 = vmul.f32 0.6931472, %v478_v39 }
 0x15e   :  { %v324_v42 = vmul.f32 %v321_v40, %v622_v26 }
 0x160   :  { %v325_v44 = vadd.f32 %v324_v42, %v323_v41 }
 0x162   :  { %v326_v45 = vsel %vm295_vm5, %v325_v44, 0.0 }
 0x163   :  { %327 = vadd.xlane.f32.xlu1 %v326_v45 }
 0x167   :  { %337 = vadd.xlane.f32.xlu1 %v336_v47 }
 0x1d4   :  { %v298_v52 = vpop.xlane.xlu0 %297 }
 0x1d5   :  { %v299_v53 = vrot.slane %v298_v52, 4 }
 0x1d7   :  { %v300_v55 = vadd.f32 %v299_v53, %v298_v52 }
 0x1d8   :  { %v350_v61 = vpop.xlane.xlu0 %349 }
 0x1d9   :  { %v301_v56 = vrot.slane %v300_v55, 2  ;;  %v351_v62 = vrot.slane %v350_v61, 4 }
 0x1db   :  { %v302_v26 = vadd.f32 %v301_v56, %v300_v55  ;;  %v352_v63 = vadd.f32 %v351_v62, %v350_v61 }
 0x1dd   :  { %v303_v58 = vrot.slane %v302_v26, 1  ;;  %v353_v4 = vrot.slane %v352_v63, 2 }
 0x1df   :  { %v304_v60 = vadd.f32 %v303_v58, %v302_v26  ;;  %v354_v11 = vadd.f32 %v353_v4, %v352_v63 }
 0x1e1   :  { %456 = vpush %v304_v60  ;;  %v355_v18 = vrot.slane %v354_v11, 1 }
 0x1e2   :  { %458 = vpush %v314_v59 }
 0x1e3   :  { %v356_v21 = vadd.f32 %v355_v18, %v354_v11 }
 0x1f0   :  { %v328_v0 = vpop.xlane.xlu1 %327 }
 0x1f1   :  { %v329_v1 = vrot.slane %v328_v0, 4 }
 0x1f3   :  { %v330_v2 = vadd.f32 %v329_v1, %v328_v0 }
 0x1f4   :  { %v338_v5 = vpop.xlane.xlu1 %337 }
 0x1f5   :  { %v331_v6 = vrot.slane %v330_v2, 2  ;;  %v339_v7 = vrot.slane %v338_v5, 4 }
 0x1f7   :  { %v340_v8 = vadd.f32 %v339_v7, %v338_v5  ;;  %v332_v9 = vadd.f32 %v331_v6, %v330_v2 }
 0x1f9   :  { %v341_v12 = vrot.slane %v340_v8, 2  ;;  %v333_v13 = vrot.slane %v332_v9, 1 }
 0x1fb   :  { %v342_v16 = vadd.f32 %v341_v12, %v340_v8  ;;  %v334_v17 = vadd.f32 %v333_v13, %v332_v9 }
 0x1fd   :  { %460 = vpush %v334_v17  ;;  %v343_v19 = vrot.slane %v342_v16, 1 }
 0x1ff   :  { %v344_v20 = vadd.f32 %v343_v19, %v342_v16 }
 0x201   :  { %462 = vpush %v344_v20 }
 0x202   :  { %464 = vpush %v356_v21 }
 0x212   :  { %s457_s1 = spop %456 }
 0x213   :  { %s459_s16 = spop %458  ;;  %v368_v25 = vstv %s457_s1 }
 0x214   :  { %v366_v23 = vstv %s459_s16 }
 0x22e   :  { %s461_s17 = spop %460 }
 0x22f   :  { %v363_v15 = vstv %s461_s17 }
 0x232   :  { %s463_s18 = spop %462 }
 0x233   :  { %s465_s19 = spop %464 }
 0x234   :  { %s358_s20 = sadd.f32 %s465_s19, %s463_s18 }
 0x236   :  { %s359_s21 = ssub.f32 0.0, %s358_s20 }
 0x238   :  { %v364_v22 = vstv %s359_s21 }
 0x239   :  { %v365_v24 = vsel %vm362_vm12, %v363_v15, %v364_v22 }
 0x23a   :  { %v367_v3 = vsel %vm361_vm15, %v366_v23, %v365_v24 }
 0x23b   :  { %v369_v27 = vsel %vm360_vm0, %v368_v25, %v367_v3 }
 0x23c   :  { %v373_v28 = vsel %vm372_vm1, %v369_v27, 0.0 }
 0x23d   :  { %374 = vst [vmem:[#allocation2] sm:$0xff] %v373_v28 }
 0x23e   :  { %490 = shalt.err (!%p487_p4)
}
 0x23f   :  { %s491_s27 = scalar_lea.hbm %s671_s2, 128 }
 0x240   :  { %p492_p5 = scmp.ne.s32.totalorder %s671_s2, %s491_s27  ;;  %p495_p6 = scmp.lt.u32.totalorder %s491_s27, %s671_s2 }
 0x242   :  { %p497_p7 = pnand %p495_p6, %p492_p5 }
 0x244   :  { %500 = shalt.err (!%p497_p7)
}
 0x245   :  { %384 = dma.vmem_to_hbm [thread:$0]  %s382_s23, 128, %s671_s2, [#allocation3]  }
 0x246   :  { %501 = dma.done.wait [#allocation3], 128  }
 0x247   :  { %502 = vsyncadd [#allocation3], 4294967168 }
 0x248   :  { %388 = vsyncpa [#allocation3], 1 }

</bundles_post_ra>
